<compile_context>
chip_gen: v7x
topology: tpu7x:2x2x1
jax: 0.10.0
libtpu: 0.0.40
codegen_flags: <defaults>
</compile_context>

<pallas_src>
import functools

import jax
import jax.numpy as jnp
from jax import lax
from jax.experimental import pallas as pl
from jax.experimental.pallas import tpu as pltpu


def _softplus(x):
    # Matches torch.nn.Softplus (beta=1, threshold=20): linear above threshold.
    return jnp.where(x > 20.0, x, jnp.log1p(jnp.exp(jnp.minimum(x, 20.0))))


def attention_kernel(x_ref, w1_ref, shift_ref, w2_ref, b2_ref,
                     attn_feat_ref, score_ref):
    # x_ref:     (Cin,  T)    channel-major input tile (T = spatial tile, lane axis)
    # w1_ref:    (Cout, Cin)  conv1 weight with BN scale pre-folded
    # shift_ref: (Cout, 1)    folded BN shift = beta - mean * scale
    # w2_ref:    (Cout, Cout) conv2 weight
    # b2_ref:    (Cout, 1)    conv2 bias
    x = x_ref[...].astype(jnp.float32)

    # conv1 (1x1, no bias) with BN scale folded in, plus BN shift.
    y = jnp.dot(w1_ref[...], x, preferred_element_type=jnp.float32)
    y = y + shift_ref[...]

    # x0 = F.normalize(y, p=2, dim=channel); channel axis is axis 0 here.
    # Single rsqrt on the (1, T) row, then a broadcast multiply.  Clamping
    # norm^2 at 1e-24 == (1e-12)^2 matches torch's clamp on the norm itself.
    norm2 = jnp.sum(y * y, axis=0, keepdims=True)
    inv_norm = lax.rsqrt(jnp.maximum(norm2, 1e-24))
    x0 = y * inv_norm

    # relu -> conv2 (1x1, with bias) -> softplus (EUP path).
    r = jnp.maximum(y, 0.0)
    s = jnp.dot(w2_ref[...], r, preferred_element_type=jnp.float32) + b2_ref[...]
    s = _softplus(s)

    attn_feat_ref[...] = (s * x0).astype(attn_feat_ref.dtype)
    score_ref[...] = s.astype(score_ref.dtype)


def _pick_spatial_tile(S, N, Cin, Cout, ts_cap):
    """Pick a lane tile (multiple of 128) that (a) divides S exactly whenever
    S is a multiple of 128 (no pad/depad HBM copies), (b) fits a ~32 MiB VMEM
    working-set budget (safe for v7x's 64 MiB VMEM), and (c) keeps the grid at
    >= 2 steps when the spatial axis can be split (v7x megacore)."""
    # Per-lane f32 bytes: double-buffered in/out pipeline buffers + intermediates.
    bytes_per_lane = 8 * Cin + 16 * Cout       # 2 * (Cin + 2*Cout) * 4  (pipeline)
    bytes_per_lane += 16 * Cout + 16           # y, x0, r, s tiles + norm row
    vmem_cap = max(128, ((32 << 20) // bytes_per_lane) // 128 * 128)
    cap = max(128, min((ts_cap // 128) * 128, vmem_cap))

    if S % 128 != 0:
        # Padding unavoidable; keep the tile lane-aligned and within budget.
        return min(cap, pl.cdiv(S, 128) * 128)

    divisors = [t for t in range(128, min(cap, S) + 1, 128) if S % t == 0]
    ts = divisors[-1]
    if N * (S // ts) < 2:
        # Prefer >= 2 grid steps so both v7x TensorCores get work.
        smaller = [t for t in divisors if S // t >= 2]
        if smaller:
            ts = smaller[-1]
    return ts


@functools.partial(jax.jit, static_argnames=("ts_cap", "eps"))
def attention_module(x_nchw, w1, bn_gamma, bn_beta, bn_mean, bn_var,
                     w2, b2, *, ts_cap=8192, eps=1e-5):
    N, Cin, H, W = x_nchw.shape
    Cout = w1.shape[0]
    S = H * W

    ts = _pick_spatial_tile(S, N, Cin, Cout, ts_cap)
    S_pad = pl.cdiv(S, ts) * ts

    # NCHW -> (N, Cin, S): channel-major already; no transposes needed.
    x_cm = x_nchw.reshape(N, Cin, S)
    if S_pad != S:
        # TODO(synk): pad + post-crop copies only happen when H*W is not a
        # multiple of 128; otherwise the tile divides S and this path is skipped.
        x_cm = jnp.pad(x_cm, ((0, 0), (0, 0), (0, S_pad - S)))

    # Fold BN (inference stats) into conv1 weight + additive shift.
    scale = bn_gamma / jnp.sqrt(bn_var + eps)                  # (Cout,)
    w1_folded = w1.reshape(Cout, Cin) * scale[:, None]         # (Cout, Cin)
    shift = (bn_beta - bn_mean * scale).reshape(Cout, 1)       # (Cout, 1)
    w2_mat = w2.reshape(Cout, Cout)                            # (Cout, Cout)
    b2_col = b2.reshape(Cout, 1)                               # (Cout, 1)

    grid = (N, S_pad // ts)

    x_spec = pl.BlockSpec((None, Cin, ts), lambda n, j: (n, 0, j))
    out_spec = pl.BlockSpec((None, Cout, ts), lambda n, j: (n, 0, j))
    full = lambda shape: pl.BlockSpec(shape, lambda n, j: (0, 0))

    attn_feat, score = pl.pallas_call(
        attention_kernel,
        out_shape=(
            jax.ShapeDtypeStruct((N, Cout, S_pad), x_nchw.dtype),
            jax.ShapeDtypeStruct((N, Cout, S_pad), x_nchw.dtype),
        ),
        grid_spec=pltpu.PrefetchScalarGridSpec(
            num_scalar_prefetch=0,
            grid=grid,
            in_specs=[
                x_spec,
                full((Cout, Cin)),
                full((Cout, 1)),
                full((Cout, Cout)),
                full((Cout, 1)),
            ],
            out_specs=[out_spec, out_spec],
        ),
        compiler_params=pltpu.CompilerParams(
            dimension_semantics=("parallel", "parallel"),
            vmem_limit_bytes=48 << 20),
    )(x_cm, w1_folded, shift, w2_mat, b2_col)

    # Crop only if padding was actually introduced (no-op otherwise).
    if S_pad != S:
        attn_feat = attn_feat[:, :, :S]
        score = score[:, :, :S]
    attn_feat = attn_feat.reshape(N, Cout, H, W)
    score = score.reshape(N, Cout, H, W)
    return attn_feat, score


if __name__ == "__main__":
    key = jax.random.PRNGKey(0)
    N, Cin, H, W = 2, 4, 16, 16
    Cout = 32

    k = jax.random.split(key, 8)
    x = jax.random.normal(k[0], (N, Cin, H, W), dtype=jnp.float32)
    # deterministic synthetic parameters (shapes from the module's __init__)
    w1 = jax.random.normal(k[1], (Cout, Cin, 1, 1), jnp.float32) * 0.1
    bn_gamma = 1.0 + 0.1 * jax.random.normal(k[2], (Cout,), jnp.float32)
    bn_beta = 0.1 * jax.random.normal(k[3], (Cout,), jnp.float32)
    bn_mean = 0.05 * jax.random.normal(k[4], (Cout,), jnp.float32)
    bn_var = jnp.abs(1.0 + 0.1 * jax.random.normal(k[5], (Cout,), jnp.float32))
    w2 = jax.random.normal(k[6], (Cout, Cout, 1, 1), jnp.float32) * 0.05
    b2 = 0.1 * jax.random.normal(k[7], (Cout,), jnp.float32)

    attn_feat, score = attention_module(
        x, w1, bn_gamma, bn_beta, bn_mean, bn_var, w2, b2)
    jax.block_until_ready((attn_feat, score))

    # pure-JAX reference (inference-mode BatchNorm semantics), NCHW throughout.
    # TODO(synk): reference assumes module.eval(); training-mode BN (batch stats)
    # is intentionally not modeled.
    y = jnp.einsum('oc,nchw->nohw', w1.reshape(Cout, Cin), x)
    sc = bn_gamma / jnp.sqrt(bn_var + 1e-5)
    y = y * sc[None, :, None, None] + (bn_beta - bn_mean * sc)[None, :, None, None]
    nrm = jnp.sqrt(jnp.sum(y * y, axis=1, keepdims=True))
    x0 = y / jnp.maximum(nrm, 1e-12)
    s = jnp.einsum('oc,nchw->nohw', w2.reshape(Cout, Cout),
                   jnp.maximum(y, 0.0)) + b2[None, :, None, None]
    s = jnp.where(s > 20.0, s, jnp.log1p(jnp.exp(jnp.minimum(s, 20.0))))
    ref_feat = s * x0
    ref_score = s
    assert jnp.allclose(attn_feat, ref_feat, atol=1e-4, rtol=1e-4)
    assert jnp.allclose(score, ref_score, atol=1e-4, rtol=1e-4)

    print("KERNEL_OK")
</pallas_src>

<mosaic_0001>
module attributes {stable_mosaic.version = 11 : i64} {
  func.func @attention_kernel(%arg0: i32, %arg1: i32, %arg2: memref<1x4x256xf32, #tpu.memory_space<vmem>>, %arg3: memref<32x4xf32, #tpu.memory_space<vmem>>, %arg4: memref<32x1xf32, #tpu.memory_space<vmem>>, %arg5: memref<32x32xf32, #tpu.memory_space<vmem>>, %arg6: memref<32x1xf32, #tpu.memory_space<vmem>>, %arg7: memref<1x32x256xf32, #tpu.memory_space<vmem>>, %arg8: memref<1x32x256xf32, #tpu.memory_space<vmem>>) attributes {dimension_semantics = [#tpu.dimension_semantics<parallel>, #tpu.dimension_semantics<parallel>], iteration_bounds = array<i64: 2, 1>, scalar_prefetch = 0 : i64, scratch_operands = 0 : i64, tpu.core_type = #tpu.core_type<tc>, window_params = [{transform_indices = @transform_0, window_bounds = array<i64: 1, 4, 256>}, {pipeline_mode = #tpu.pipeline_mode<synchronous>, transform_indices = @transform_1, window_bounds = array<i64: 32, 4>}, {pipeline_mode = #tpu.pipeline_mode<synchronous>, transform_indices = @transform_2, window_bounds = array<i64: 32, 1>}, {pipeline_mode = #tpu.pipeline_mode<synchronous>, transform_indices = @transform_3, window_bounds = array<i64: 32, 32>}, {pipeline_mode = #tpu.pipeline_mode<synchronous>, transform_indices = @transform_4, window_bounds = array<i64: 32, 1>}, {transform_indices = @transform_5, window_bounds = array<i64: 1, 32, 256>}, {transform_indices = @transform_6, window_bounds = array<i64: 1, 32, 256>}]} {
    %c0 = arith.constant 0 : index
    %c0_0 = arith.constant 0 : index
    %c0_1 = arith.constant 0 : index
    %0 = vector.load %arg2[%c0, %c0_0, %c0_1] : memref<1x4x256xf32, #tpu.memory_space<vmem>>, vector<1x4x256xf32>
    %1 = vector.shape_cast %0 : vector<1x4x256xf32> to vector<4x256xf32>
    %c0_2 = arith.constant 0 : index
    %c0_3 = arith.constant 0 : index
    %2 = vector.load %arg3[%c0_2, %c0_3] : memref<32x4xf32, #tpu.memory_space<vmem>>, vector<32x4xf32>
    %cst = arith.constant dense<0.000000e+00> : vector<32x256xf32>
    %3 = tpu.matmul %2, %1, %cst {dimension_numbers = #tpu.dot_dimension_numbers<[1], [0], [0], [1], [0, 0, 1, 1], [], []>} : vector<32x4xf32>, vector<4x256xf32>, vector<32x256xf32> -> vector<32x256xf32>
    %c0_4 = arith.constant 0 : index
    %c0_5 = arith.constant 0 : index
    %4 = vector.load %arg4[%c0_4, %c0_5] : memref<32x1xf32, #tpu.memory_space<vmem>>, vector<32x1xf32>
    %5 = vector.broadcast %4 : vector<32x1xf32> to vector<32x256xf32>
    %6 = arith.addf %3, %5 : vector<32x256xf32>
    %7 = arith.mulf %6, %6 : vector<32x256xf32>
    %cst_6 = arith.constant dense<0.000000e+00> : vector<256xf32>
    %8 = vector.multi_reduction <add>, %7, %cst_6 [0] : vector<32x256xf32> to vector<256xf32>
    %9 = vector.shape_cast %8 : vector<256xf32> to vector<1x256xf32>
    %cst_7 = arith.constant 1.000000e-24 : f32
    %10 = vector.broadcast %cst_7 : f32 to vector<1x256xf32>
    %11 = arith.maximumf %9, %10 : vector<1x256xf32>
    %12 = math.rsqrt %11 : vector<1x256xf32>
    %13 = vector.broadcast %12 : vector<1x256xf32> to vector<32x256xf32>
    %14 = arith.mulf %6, %13 : vector<32x256xf32>
    %cst_8 = arith.constant 0.000000e+00 : f32
    %15 = vector.broadcast %cst_8 : f32 to vector<32x256xf32>
    %16 = arith.maximumf %6, %15 : vector<32x256xf32>
    %c0_9 = arith.constant 0 : index
    %c0_10 = arith.constant 0 : index
    %17 = vector.load %arg5[%c0_9, %c0_10] : memref<32x32xf32, #tpu.memory_space<vmem>>, vector<32x32xf32>
    %cst_11 = arith.constant dense<0.000000e+00> : vector<32x256xf32>
    %18 = tpu.matmul %17, %16, %cst_11 {dimension_numbers = #tpu.dot_dimension_numbers<[1], [0], [0], [1], [0, 0, 1, 1], [], []>} : vector<32x32xf32>, vector<32x256xf32>, vector<32x256xf32> -> vector<32x256xf32>
    %c0_12 = arith.constant 0 : index
    %c0_13 = arith.constant 0 : index
    %19 = vector.load %arg6[%c0_12, %c0_13] : memref<32x1xf32, #tpu.memory_space<vmem>>, vector<32x1xf32>
    %20 = vector.broadcast %19 : vector<32x1xf32> to vector<32x256xf32>
    %21 = arith.addf %18, %20 : vector<32x256xf32>
    %cst_14 = arith.constant 2.000000e+01 : f32
    %22 = vector.broadcast %cst_14 : f32 to vector<32x256xf32>
    %23 = arith.cmpf ogt, %21, %22 : vector<32x256xf32>
    %cst_15 = arith.constant 2.000000e+01 : f32
    %24 = vector.broadcast %cst_15 : f32 to vector<32x256xf32>
    %25 = arith.minimumf %21, %24 : vector<32x256xf32>
    %26 = math.exp %25 : vector<32x256xf32>
    %27 = math.log1p %26 : vector<32x256xf32>
    %28 = arith.select %23, %21, %27 : vector<32x256xi1>, vector<32x256xf32>
    %29 = arith.mulf %28, %14 : vector<32x256xf32>
    %c0_16 = arith.constant 0 : index
    %c0_17 = arith.constant 0 : index
    %c0_18 = arith.constant 0 : index
    %30 = vector.load %arg7[%c0_16, %c0_17, %c0_18] : memref<1x32x256xf32, #tpu.memory_space<vmem>>, vector<1x32x256xf32>
    %31 = vector.shape_cast %30 : vector<1x32x256xf32> to vector<32x256xf32>
    %32 = vector.shape_cast %29 : vector<32x256xf32> to vector<1x32x256xf32>
    tpu.vector_store %arg7[%c0_16, %c0_17, %c0_18], %32 {strides = array<i32>} : memref<1x32x256xf32, #tpu.memory_space<vmem>>, vector<1x32x256xf32>,
    %c0_19 = arith.constant 0 : index
    %c0_20 = arith.constant 0 : index
    %c0_21 = arith.constant 0 : index
    %33 = vector.load %arg8[%c0_19, %c0_20, %c0_21] : memref<1x32x256xf32, #tpu.memory_space<vmem>>, vector<1x32x256xf32>
    %34 = vector.shape_cast %33 : vector<1x32x256xf32> to vector<32x256xf32>
    %35 = vector.shape_cast %28 : vector<32x256xf32> to vector<1x32x256xf32>
    tpu.vector_store %arg8[%c0_19, %c0_20, %c0_21], %35 {strides = array<i32>} : memref<1x32x256xf32, #tpu.memory_space<vmem>>, vector<1x32x256xf32>,
    return
  }
  func.func @transform_0(%arg0: i32, %arg1: i32) -> (i32, i32, i32) {
    %c0_i32 = arith.constant 0 : i32
    %c0_i32_0 = arith.constant 0 : i32
    return %arg0, %c0_i32, %arg1 : i32, i32, i32
  }
  func.func @transform_1(%arg0: i32, %arg1: i32) -> (i32, i32) {
    %c0_i32 = arith.constant 0 : i32
    %c0_i32_0 = arith.constant 0 : i32
    %c0_i32_1 = arith.constant 0 : i32
    return %c0_i32, %c0_i32_0 : i32, i32
  }
  func.func @transform_2(%arg0: i32, %arg1: i32) -> (i32, i32) {
    %c0_i32 = arith.constant 0 : i32
    %c0_i32_0 = arith.constant 0 : i32
    %c0_i32_1 = arith.constant 0 : i32
    return %c0_i32, %c0_i32_0 : i32, i32
  }
  func.func @transform_3(%arg0: i32, %arg1: i32) -> (i32, i32) {
    %c0_i32 = arith.constant 0 : i32
    %c0_i32_0 = arith.constant 0 : i32
    %c0_i32_1 = arith.constant 0 : i32
    return %c0_i32, %c0_i32_0 : i32, i32
  }
  func.func @transform_4(%arg0: i32, %arg1: i32) -> (i32, i32) {
    %c0_i32 = arith.constant 0 : i32
    %c0_i32_0 = arith.constant 0 : i32
    %c0_i32_1 = arith.constant 0 : i32
    return %c0_i32, %c0_i32_0 : i32, i32
  }
  func.func @transform_5(%arg0: i32, %arg1: i32) -> (i32, i32, i32) {
    %c0_i32 = arith.constant 0 : i32
    %c0_i32_0 = arith.constant 0 : i32
    return %arg0, %c0_i32, %arg1 : i32, i32, i32
  }
  func.func @transform_6(%arg0: i32, %arg1: i32) -> (i32, i32, i32) {
    %c0_i32 = arith.constant 0 : i32
    %c0_i32_0 = arith.constant 0 : i32
    return %arg0, %c0_i32, %arg1 : i32, i32, i32
  }
}

</mosaic_0001>

<bundles_post_ra>
// kernel: attention_module.1
= control target key start
LH: loop header
LB: loop body
LE: loop exit
PB: predicated region body
PF: predicated region fallthrough
CT: control target
= control target key end

     0   :  { %s1062_s21 = smov 0   ;;  %s1064_s22 = smov 0   ;;  %s1328_s0 = inlined_call_operand.vmem [shape: f32[2,4,256], index: 0, kind: input, shape index: {}]   ;;  %s1329_s1 = inlined_call_operand.vmem [shape: f32[32,4], index: 1, kind: input, shape index: {}]   ;;  %s1330_s2 = inlined_call_operand.vmem [shape: f32[32,1], index: 2, kind: input, shape index: {}]   ;;  %s1331_s3 = inlined_call_operand.vmem [shape: f32[32,32], index: 3, kind: input, shape index: {}]   ;;  %s1332_s4 = inlined_call_operand.vmem [shape: f32[32,1], index: 4, kind: input, shape index: {}]   ;;  %s1333_s5 = inlined_call_operand.vmem [shape: f32[2,32,256], index: 5, kind: output, shape index: {0}]   ;;  %s1334_s6 = inlined_call_operand.vmem [shape: f32[2,32,256], index: 6, kind: output, shape index: {1}]  }
   0x1   :  { %s1066_s23 = smov 0  }
   0x2 LB: > { %s29_s24 = sadd.s32 1, %s1019_s22  ;;  %p906_p0 = scmp.ge.s32.totalorder %s1023_s23, 1  ;;  %s1023_s23 = sphi %s1066_s23, %s17_s23   ;;  %s1019_s22 = sphi %s1064_s22, %s1344_s22   ;;  %s1015_s21 = sphi %s1062_s21, %s1343_s21  }
   0x3   : > { %p31_p1 = scmp.ge.s32.totalorder %s29_s24, 2  ;;  %p238_p2 = scmp.lt.s32.totalorder %s1023_s23, 3 }
   0x5   : > { %s1346_s24 = smov (%p31_p1, %s29_s24), 0  ;;  %p239_p3 = pnand %p906_p0, %p238_p2 }
   0x6   : > { %p286_p4 = scmp.lt.s32.totalorder (!%p239_p3), %s1015_s21, 1  ;;  %v1025_v0 = vmov (!%p239_p3), 0.0   ;;  %v320_v1 = vld [vmem:[%s1330_s2] sm:$0xff] (!%p239_p3)  ;;  %v1026_v2 = vmov (!%p239_p3), 0   ;;  %v322_v3 = vld [vmem:[%s1330_s2 + $0x10] sm:$0xff] (!%p239_p3)  ;;  %v321_v4 = vld [vmem:[%s1330_s2 + $0x8] sm:$0xff] (!%p239_p3) }
   0x7   : > { %242 = sbr.rel (%p239_p3) target bundleno = 529 (0x211), region = 40  ;;  %428 = vmatprep.mubr.f32.mxu0 (!%p239_p3), %v1025_v0  ;;  %604 = vmatprep.mubr.f32.mxu1 (!%p239_p3), %v1025_v0  ;;  %v323_v5 = vld [vmem:[%s1330_s2 + $0x18] sm:$0xff] (!%p239_p3)  ;;  %vm359_vm0 = vcmask (!%p239_p3), 1043456   ;;  %v316_v8 = vld [vmem:[%s1329_s1] sm:$0xff] (!%p239_p3)  ;;  %vm346_vm1 = vcmask (!%p239_p3), 31744   ;;  %v504_v10 = vld [vmem:[%s1332_s4 + $0x8] sm:$0xff] (!%p239_p3) }
   0x8   : > { %962 = vset.pattern.permute.xlu0 (!%p239_p3), %v1026_v2  ;;  %963 = vset.pattern.permute.xlu1 (!%p239_p3), %v1026_v2  ;;  %v503_v9 = vld [vmem:[%s1332_s4] sm:$0xff] (!%p239_p3)  ;;  %v317_v11 = vld [vmem:[%s1329_s1 + $0x8] sm:$0xff] (!%p239_p3)  ;;  %v505_v12 = vld [vmem:[%s1332_s4 + $0x10] sm:$0xff] (!%p239_p3)  ;;  %vm527_vm2 = vcmask (!%p239_p3), 261120  }
   0x9   : > { %326 = vperm.xlu0 (!%p239_p3), %962, %v320_v1   ;;  %336 = vperm.xlu1 (!%p239_p3), %963, %v322_v3   ;;  %v506_v13 = vld [vmem:[%s1332_s4 + $0x18] sm:$0xff] (!%p239_p3)  ;;  %v318_v14 = vld [vmem:[%s1329_s1 + $0x10] sm:$0xff] (!%p239_p3)  ;;  %v499_v2 = vld [vmem:[%s1331_s3] sm:$0xff] (!%p239_p3) }
   0xa   : > { %v319_v15 = vld [vmem:[%s1329_s1 + $0x18] sm:$0xff] (!%p239_p3) }
   0xd   : > { %331 = vperm.xlu0 (!%p239_p3), %962, %v321_v4   ;;  %341 = vperm.xlu1 (!%p239_p3), %963, %v323_v5  }
   0xe   : > { %s1348_s21 = smov (!%p286_p4, %s1015_s21), 1 }
   0xf   : > { %s925_s29 = sshll.u32 %s1348_s21, 3  ;;  %s926_s17 = sshll.u32 %s1348_s21, 6 }
  0x10   : > { %s293_s12 = scalar_lea.vmem %s1328_s0, %s925_s29  ;;  %s1243_s19 = scalar_lea.vmem %s1334_s6, %s926_s17 }
  0x11   : > { %v315_v6 = vld [vmem:[%s293_s12] sm:$0xff]  ;;  %509 = vperm.xlu0 %962, %v503_v9   ;;  %514 = vperm.xlu1 %963, %v504_v10   ;;  %s1256_s26 = scalar_lea.vmem %s1333_s5, %s926_s17 }
  0x12   : > { %v345_v7 = vcombine.high %v315_v6, %v315_v6 }
  0x14   : > { %913 = vmatprep.subr.msk.mxu0 %vm359_vm0, %v345_v7  ;;  %v500_v7 = vld [vmem:[%s1331_s3 + $0x8] sm:$0xff] }
  0x15   : > { %914 = vmatpush1.msk.msra.mxu0 %vm359_vm0, %v315_v6  ;;  %519 = vperm.xlu0 %962, %v505_v12   ;;  %v501_v12 = vld [vmem:[%s1331_s3 + $0x10] sm:$0xff] }
  0x16   : > { %915 = vmatmul.mubr.msk.f32.vlgmr.msra.gmra.mrb[0].mxu0 %vm346_vm1, %v316_v8  ;;  %524 = vperm.xlu1 %963, %v506_v13  }
  0x17   : > { %434 = vmatprep.mubr.f32.mxu0 %v1025_v0 }
  0x1a   : > { %916 = vmatmul.mubr.msk.f32.gmra.mrb[2].mxu0 %vm346_vm1, %v317_v11 }
  0x1b   : > { %440 = vmatprep.mubr.f32.mxu0 %v1025_v0 }
  0x1e   : > { %917 = vmatmul.mubr.msk.f32.gmra.mrb[4].mxu0 %vm346_vm1, %v318_v14 }
  0x1f   : > { %446 = vmatprep.mubr.f32.mxu0 %v1025_v0 }
  0x22   : > { %918 = vmatmul.mubr.msk.f32.gmra.mrb[6].mxu0 %vm346_vm1, %v319_v15 }
  0x88   : > { %v327_v16 = vpop.permute.xlu0 %326  ;;  %v337_v25 = vpop.permute.xlu1 %336 }
  0x8c   : > { %v332_v20 = vpop.permute.xlu0 %331  ;;  %v342_v44 = vpop.permute.xlu1 %341 }
  0xe9   : > { %v430_v17 = vpop.f32.mrb[0].mxu0 }
  0xea   : > { %v432_v18 = vpop.f32.mrb[1].mxu0  ;;  %v1131_v19 = vadd.f32 %v430_v17, %v327_v16 }
  0xeb   : > { %v1133_v21 = vadd.f32 %v432_v18, %v327_v16  ;;  %v502_v16 = vld [vmem:[%s1331_s3 + $0x18] sm:$0xff] }
  0xec   : > { %v453_v27 = vmul.f32 %v1131_v19, %v1131_v19  ;;  %v491_v29 = vmax.f32 %v1131_v19, 0.0 }
  0xed   : > { %v436_v22 = vpop.f32.mrb[2].mxu0  ;;  %v454_v31 = vmul.f32 %v1133_v21, %v1133_v21  ;;  %v492_v34 = vmax.f32 %v1133_v21, 0.0 }
  0xee   : > { %v1135_v23 = vadd.f32 %v436_v22, %v332_v20  ;;  %v438_v24 = vpop.f32.mrb[3].mxu0 }
  0xef   : > { %v1137_v26 = vadd.f32 %v438_v24, %v332_v20 }
  0xf0   : > { %v455_v28 = vmul.f32 %v1135_v23, %v1135_v23  ;;  %v493_v30 = vmax.f32 %v1135_v23, 0.0 }
  0xf1   : > { %v456_v32 = vmul.f32 %v1137_v26, %v1137_v26  ;;  %v442_v33 = vpop.f32.mrb[4].mxu0  ;;  %v494_v35 = vmax.f32 %v1137_v26, 0.0 }
  0xf2   : > { %v461_v36 = vadd.f32 %v455_v28, %v453_v27  ;;  %v443_v37 = vadd.f32 %v442_v33, %v337_v25  ;;  %v444_v38 = vpop.f32.mrb[5].mxu0  ;;  %v930_v39 = vpack.c.bf16 %v493_v30, %v491_v29  ;;  %v510_v30 = vpop.permute.xlu0 %509 }
  0xf3   : > { %v470_v40 = vadd.f32 %v456_v32, %v454_v31  ;;  %v445_v41 = vadd.f32 %v444_v38, %v337_v25  ;;  %v928_v42 = vpack.c.bf16 %v494_v35, %v492_v34  ;;  %v515_v34 = vpop.permute.xlu1 %514 }
  0xf4   : > { %v457_v43 = vmul.f32 %v443_v37, %v443_v37  ;;  %v495_v52 = vmax.f32 %v443_v37, 0.0 }
  0xf5   : > { %v458_v45 = vmul.f32 %v445_v41, %v445_v41  ;;  %v448_v46 = vpop.f32.mrb[6].mxu0  ;;  %929 = vmatprep.subr.bf16.mxu1 %v928_v42  ;;  %v496_v55 = vmax.f32 %v445_v41, 0.0 }
  0xf6   : > { %v462_v47 = vadd.f32 %v461_v36, %v457_v43  ;;  %v449_v48 = vadd.f32 %v448_v46, %v342_v44  ;;  %v450_v49 = vpop.f32.mrb[7].mxu0  ;;  %931 = vmatpush1.bf16.msra.mxu1 %v930_v39 }
  0xf7   : > { %v471_v50 = vadd.f32 %v470_v40, %v458_v45  ;;  %v451_v51 = vadd.f32 %v450_v49, %v342_v44 }
  0xf8   : > { %v459_v53 = vmul.f32 %v449_v48, %v449_v48  ;;  %v497_v54 = vmax.f32 %v449_v48, 0.0 }
  0xf9   : > { %v460_v56 = vmul.f32 %v451_v51, %v451_v51  ;;  %v498_v57 = vmax.f32 %v451_v51, 0.0 }
  0xfa   : > { %v463_v58 = vadd.f32 %v462_v47, %v459_v53  ;;  %v934_v59 = vpack.c.bf16 %v497_v54, %v495_v52 }
  0xfb   : > { %v472_v60 = vadd.f32 %v471_v50, %v460_v56  ;;  %v932_v61 = vpack.c.bf16 %v498_v57, %v496_v55  ;;  %v525_v50 = vpop.permute.xlu1 %524 }
  0xfc   : > { %v464_v62 = vrot.slane %v463_v58, 4 }
  0xfd   : > { %v473_v63 = vrot.slane %v472_v60, 4  ;;  %933 = vmatprep.subr.bf16.mxu1 %v932_v61 }
  0xfe   : > { %v465_v1 = vadd.f32 %v464_v62, %v463_v58  ;;  %935 = vmatpush1.bf16.msra.mxu1 %v934_v59 }
  0xff   : > { %v474_v3 = vadd.f32 %v473_v63, %v472_v60 }
 0x100   : > { %v466_v4 = vrot.slane %v465_v1, 2 }
 0x101   : > { %v475_v5 = vrot.slane %v474_v3, 2  ;;  %919 = vmatmul.mubr.msk.f32.vlgmr.msra.gmra.mrb[0].mxu1 %vm527_vm2, %v499_v2 }
 0x102   : > { %v467_v6 = vadd.f32 %v466_v4, %v465_v1  ;;  %610 = vmatprep.mubr.f32.mxu1 %v1025_v0 }
 0x103   : > { %v476_v8 = vadd.f32 %v475_v5, %v474_v3 }
 0x104   : > { %v468_v9 = vrot.slane %v467_v6, 1 }
 0x105   : > { %v477_v10 = vrot.slane %v476_v8, 1  ;;  %920 = vmatmul.mubr.msk.f32.gmra.mrb[2].mxu1 %vm527_vm2, %v500_v7 }
 0x106   : > { %v469_v11 = vadd.f32 %v468_v9, %v467_v6  ;;  %616 = vmatprep.mubr.f32.mxu1 %v1025_v0 }
 0x107   : > { %v478_v13 = vadd.f32 %v477_v10, %v476_v8 }
 0x108   : > { %v479_v14 = vmax.f32 %v469_v11, 1e-24 }
 0x109   : > { %v480_v15 = vmax.f32 %v478_v13, 1e-24  ;;  %921 = vmatmul.mubr.msk.f32.gmra.mrb[4].mxu1 %vm527_vm2, %v501_v12 }
 0x10a   : > { %965 = vrsqrt.f32 %v479_v14  ;;  %622 = vmatprep.mubr.f32.mxu1 %v1025_v0 }
 0x10b   : > { %967 = vrsqrt.f32 %v480_v15 }
 0x10d   : > { %922 = vmatmul.mubr.msk.f32.gmra.mrb[6].mxu1 %vm527_vm2, %v502_v16 }
 0x114   : > { %v966_v17 = vpop.eup %965 }
 0x115   : > { %v968_v18 = vpop.eup %967  ;;  %v1170_v20 = vmul.f32 %v966_v17, %v449_v48  ;;  %v1173_v22 = vmul.f32 %v966_v17, %v1131_v19  ;;  %v1176_v24 = vmul.f32 %v966_v17, %v1135_v23  ;;  %v1178_v25 = vmul.f32 %v966_v17, %v443_v37 }
 0x116   : > { %v1180_v0 = vmul.f32 %v968_v18, %v451_v51  ;;  %v1183_v27 = vmul.f32 %v968_v18, %v1133_v21  ;;  %v1186_v28 = vmul.f32 %v968_v18, %v1137_v26  ;;  %v1188_v29 = vmul.f32 %v968_v18, %v445_v41  ;;  %v520_v41 = vpop.permute.xlu0 %519 }
 0x1d4   : > { %v606_v31 = vpop.f32.mrb[0].mxu1 }
 0x1d5   : > { %v1190_v32 = vadd.f32 %v606_v31, %v510_v30  ;;  %v608_v19 = vpop.f32.mrb[1].mxu1 }
 0x1d6   : > { %v1192_v33 = vadd.f32 %v608_v19, %v510_v30 }
 0x1d7   : > { %v637_v23 = vmin.f32 %v1190_v32, 20.0  ;;  %vm629_vm3 = vcmp.gt.f32.partialorder %v1190_v32, 20.0 }
 0x1d8   : > { %v638_v35 = vmin.f32 %v1192_v33, 20.0  ;;  %v612_v36 = vpop.f32.mrb[2].mxu1  ;;  %vm630_vm4 = vcmp.gt.f32.partialorder %v1192_v33, 20.0 }
 0x1d9   : > { %v645_v21 = vmul.f32 1.442695, %v637_v23  ;;  %v1196_v37 = vadd.f32 %v612_v36, %v515_v34  ;;  %v614_v26 = vpop.f32.mrb[3].mxu1 }
 0x1da   : > { %v647_v38 = vmul.f32 1.442695, %v638_v35  ;;  %v1198_v39 = vadd.f32 %v614_v26, %v515_v34 }
 0x1db   : > { %969 = vpow2.f32 %v645_v21  ;;  %v639_v40 = vmin.f32 %v1196_v37, 20.0  ;;  %vm631_vm5 = vcmp.gt.f32.partialorder %v1196_v37, 20.0 }
 0x1dc   : > { %971 = vpow2.f32 %v647_v38  ;;  %v640_v42 = vmin.f32 %v1198_v39, 20.0  ;;  %v618_v43 = vpop.f32.mrb[4].mxu1  ;;  %vm632_vm9 = vcmp.gt.f32.partialorder %v1198_v39, 20.0 }
 0x1dd   : > { %v649_v44 = vmul.f32 1.442695, %v639_v40  ;;  %v1202_v45 = vadd.f32 %v618_v43, %v520_v41  ;;  %v620_v46 = vpop.f32.mrb[5].mxu1 }
 0x1de   : > { %v651_v47 = vmul.f32 1.442695, %v640_v42  ;;  %v1204_v48 = vadd.f32 %v620_v46, %v520_v41 }
 0x1df   : > { %973 = vpow2.f32 %v649_v44  ;;  %v641_v49 = vmin.f32 %v1202_v45, 20.0  ;;  %vm633_vm12 = vcmp.gt.f32.partialorder %v1202_v45, 20.0 }
 0x1e0   : > { %975 = vpow2.f32 %v651_v47  ;;  %v642_v51 = vmin.f32 %v1204_v48, 20.0  ;;  %v624_v52 = vpop.f32.mrb[6].mxu1  ;;  %vm634_vm14 = vcmp.gt.f32.partialorder %v1204_v48, 20.0 }
 0x1e1   : > { %v653_v53 = vmul.f32 1.442695, %v641_v49  ;;  %v1208_v54 = vadd.f32 %v624_v52, %v525_v50  ;;  %v626_v55 = vpop.f32.mrb[7].mxu1 }
 0x1e2   : > { %v655_v56 = vmul.f32 1.442695, %v642_v51  ;;  %v1211_v63 = vadd.f32 %v626_v55, %v525_v50 }
 0x1e3   : > { %977 = vpow2.f32 %v653_v53  ;;  %v643_v57 = vmin.f32 %v1208_v54, 20.0  ;;  %vm635_vm0 = vcmp.gt.f32.partialorder %v1208_v54, 20.0 }
 0x1e4   : > { %979 = vpow2.f32 %v655_v56  ;;  %v644_v7 = vmin.f32 %v1211_v63, 20.0  ;;  %vm636_vm2 = vcmp.gt.f32.partialorder %v1211_v63, 20.0 }
 0x1e5   : > { %v970_v58 = vpop.eup %969  ;;  %v657_v59 = vmul.f32 1.442695, %v643_v57 }
 0x1e6   : > { %v972_v60 = vpop.eup %971  ;;  %v661_v61 = vadd.f32 1.0, %v970_v58  ;;  %v664_v4 = vmul.f32 -0.5, %v970_v58  ;;  %v667_v11 = vand.u32 2147483647, %v970_v58  ;;  %v659_v17 = vmul.f32 1.442695, %v644_v7 }
 0x1e7   : > { %v670_v62 = vadd.f32 1.0, %v972_v60  ;;  %981 = vpow2.f32 %v657_v59  ;;  %v673_v5 = vmul.f32 -0.5, %v972_v60  ;;  %v676_v12 = vand.u32 2147483647, %v972_v60 }
 0x1e8   : > { %983 = vlog2.f32 %v661_v61  ;;  %v665_v14 = vadd.f32 1.0, %v664_v4  ;;  %vm1230_vm6 = vcmp.lt.f32.partialorder %v667_v11, 0.0004427343 }
 0x1e9   : > { %v974_v1 = vpop.eup %973  ;;  %985 = vlog2.f32 %v670_v62  ;;  %v674_v15 = vadd.f32 1.0, %v673_v5  ;;  %vm1234_vm7 = vcmp.lt.f32.partialorder %v676_v12, 0.0004427343 }
 0x1ea   : > { %v1213_v2 = vpop.eup %975  ;;  %v679_v3 = vadd.f32 1.0, %v974_v1  ;;  %v682_v9 = vmul.f32 -0.5, %v974_v1  ;;  %v685_v19 = vand.u32 2147483647, %v974_v1  ;;  %v666_v40 = vmul.f32 %v970_v58, %v665_v14 }
 0x1eb   : > { %v688_v6 = vadd.f32 1.0, %v1213_v2  ;;  %v691_v18 = vmul.f32 -0.5, %v1213_v2  ;;  %v675_v41 = vmul.f32 %v972_v60, %v674_v15  ;;  %v694_v50 = vand.u32 2147483647, %v1213_v2 }
 0x1ec   : > { %987 = vlog2.f32 %v679_v3  ;;  %v683_v31 = vadd.f32 1.0, %v682_v9  ;;  %vm1248_vm8 = vcmp.lt.f32.partialorder %v685_v19, 0.0004427343 }
 0x1ed   : > { %v1217_v8 = vpop.eup %977  ;;  %989 = vlog2.f32 %v688_v6  ;;  %v692_v43 = vadd.f32 1.0, %v691_v18  ;;  %vm695_vm10 = vcmp.lt.f32.partialorder %v694_v50, 0.0004427343 }
 0x1ee   : > { %v1219_v10 = vpop.eup %979  ;;  %v697_v13 = vadd.f32 1.0, %v1217_v8  ;;  %v700_v36 = vmul.f32 -0.5, %v1217_v8  ;;  %v684_v47 = vmul.f32 %v974_v1, %v683_v31  ;;  %v703_v56 = vand.u32 2147483647, %v1217_v8 }
 0x1ef   : > { %v706_v16 = vadd.f32 1.0, %v1219_v10  ;;  %v709_v44 = vmul.f32 -0.5, %v1219_v10  ;;  %v693_v1 = vmul.f32 %v1213_v2, %v692_v43 }
 0x1f0   : > { %991 = vlog2.f32 %v697_v13  ;;  %v701_v55 = vadd.f32 1.0, %v700_v36  ;;  %vm1283_vm11 = vcmp.lt.f32.partialorder %v703_v56, 0.0004427343 }
 0x1f1   : > { %v1226_v30 = vpop.eup %981  ;;  %993 = vlog2.f32 %v706_v16  ;;  %v710_v3 = vadd.f32 1.0, %v709_v44 }
 0x1f2   : > { %v984_v23 = vpop.eup %983  ;;  %v715_v21 = vadd.f32 1.0, %v1226_v30  ;;  %995 = vpow2.f32 %v659_v17  ;;  %v718_v61 = vmul.f32 -0.5, %v1226_v30  ;;  %v702_v2 = vmul.f32 %v1217_v8, %v701_v55 }
 0x1f3   : > { %v986_v26 = vpop.eup %985  ;;  %v663_v38 = vmul.f32 0.6931472, %v984_v23  ;;  %v711_v8 = vmul.f32 %v1219_v10, %v710_v3  ;;  %v721_v15 = vand.u32 2147483647, %v1226_v30 }
 0x1f4   : > { %v672_v42 = vmul.f32 0.6931472, %v986_v26  ;;  %997 = vlog2.f32 %v715_v21  ;;  %v719_v13 = vadd.f32 1.0, %v718_v61 }
 0x1f5   : > { %v669_v46 = vsel %vm1230_vm6, %v666_v40, %v663_v38  ;;  %vm722_vm15 = vcmp.lt.f32.partialorder %v721_v15, 0.0004427343 }
 0x1f6   : > { %v988_v51 = vpop.eup %987  ;;  %v733_v52 = vsel %vm629_vm3, %v1190_v32, %v669_v46  ;;  %v678_v53 = vsel %vm1234_vm7, %v675_v41, %v672_v42  ;;  %v720_v23 = vmul.f32 %v1226_v30, %v719_v13 }
 0x1f7   : > { %v990_v57 = vpop.eup %989  ;;  %v741_v58 = vmul.f32 %v733_v52, %v1173_v22  ;;  %757 = vst [vmem:[%s1243_s19] sm:$0xff] %v733_v52  ;;  %v734_v59 = vsel %vm630_vm4, %v1192_v33, %v678_v53  ;;  %v681_v60 = vmul.f32 0.6931472, %v988_v51  ;;  %v712_v33 = vand.u32 2147483647, %v1219_v10 }
 0x1f8   : > { %v742_v32 = vmul.f32 %v734_v59, %v1183_v27  ;;  %758 = vst [vmem:[%s1243_s19 + $0x8] sm:$0xff] %v734_v59  ;;  %v690_v62 = vmul.f32 0.6931472, %v990_v57 }
 0x1f9   : > { %749 = vst [vmem:[%s1256_s26] sm:$0xff] %v741_v58  ;;  %v687_v22 = vsel %vm1248_vm8, %v684_v47, %v681_v60  ;;  %vm713_vm13 = vcmp.lt.f32.partialorder %v712_v33, 0.0004427343 }
 0x1fa   : > { %v992_v4 = vpop.eup %991  ;;  %750 = vst [vmem:[%s1256_s26 + $0x8] sm:$0xff] %v742_v32  ;;  %v735_v27 = vsel %vm631_vm5, %v1196_v37, %v687_v22  ;;  %v696_v5 = vsel %vm695_vm10, %v693_v1, %v690_v62 }
 0x1fb   : > { %v994_v7 = vpop.eup %993  ;;  %v743_v9 = vmul.f32 %v735_v27, %v1176_v24  ;;  %759 = vst [vmem:[%s1243_s19 + $0x10] sm:$0xff] %v735_v27  ;;  %v736_v11 = vsel %vm632_vm9, %v1198_v39, %v696_v5  ;;  %v699_v12 = vmul.f32 0.6931472, %v992_v4 }
 0x1fc   : > { %v744_v14 = vmul.f32 %v736_v11, %v1186_v28  ;;  %760 = vst [vmem:[%s1243_s19 + $0x18] sm:$0xff] %v736_v11  ;;  %v708_v37 = vmul.f32 0.6931472, %v994_v7  ;;  %v996_v16 = vpop.eup %995 }
 0x1fd   : > { %751 = vst [vmem:[%s1256_s26 + $0x10] sm:$0xff] %v743_v9  ;;  %v705_v24 = vsel %vm1283_vm11, %v702_v2, %v699_v12  ;;  %v724_v17 = vadd.f32 1.0, %v996_v16  ;;  %v730_v36 = vand.u32 2147483647, %v996_v16 }
 0x1fe   : > { %v998_v39 = vpop.eup %997  ;;  %752 = vst [vmem:[%s1256_s26 + $0x18] sm:$0xff] %v744_v14  ;;  %v737_v28 = vsel %vm633_vm12, %v1202_v45, %v705_v24  ;;  %v714_v10 = vsel %vm713_vm13, %v711_v8, %v708_v37 }
 0x1ff   : > { %v745_v18 = vmul.f32 %v737_v28, %v1178_v25  ;;  %761 = vst [vmem:[%s1243_s19 + $0x20] sm:$0xff] %v737_v28  ;;  %v738_v31 = vsel %vm634_vm14, %v1204_v48, %v714_v10  ;;  %v717_v19 = vmul.f32 0.6931472, %v998_v39  ;;  %999 = vlog2.f32 %v724_v17 }
 0x200   : > { %v746_v34 = vmul.f32 %v738_v31, %v1188_v29  ;;  %762 = vst [vmem:[%s1243_s19 + $0x28] sm:$0xff] %v738_v31  ;;  %v727_v48 = vmul.f32 -0.5, %v996_v16  ;;  %vm731_vm1 = vcmp.lt.f32.partialorder %v730_v36, 0.0004427343 }
 0x201   : > { %753 = vst [vmem:[%s1256_s26 + $0x20] sm:$0xff] %v745_v18  ;;  %v723_v45 = vsel %vm722_vm15, %v720_v23, %v717_v19 }
 0x202   : > { %754 = vst [vmem:[%s1256_s26 + $0x28] sm:$0xff] %v746_v34  ;;  %v739_v25 = vsel %vm635_vm0, %v1208_v54, %v723_v45  ;;  %v728_v30 = vadd.f32 1.0, %v727_v48 }
 0x203   : > { %v747_v35 = vmul.f32 %v739_v25, %v1170_v20  ;;  %763 = vst [vmem:[%s1243_s19 + $0x30] sm:$0xff] %v739_v25 }
 0x204   : > { %v729_v26 = vmul.f32 %v996_v16, %v728_v30 }
 0x205   : > { %755 = vst [vmem:[%s1256_s26 + $0x30] sm:$0xff] %v747_v35 }
 0x209   : > { %v1000_v29 = vpop.eup %999 }
 0x20a   : > { %v726_v21 = vmul.f32 0.6931472, %v1000_v29 }
 0x20c   : > { %v732_v38 = vsel %vm731_vm1, %v729_v26, %v726_v21 }
 0x20d   : > { %v740_v40 = vsel %vm636_vm2, %v1211_v63, %v732_v38 }
 0x20e   : > { %v748_v41 = vmul.f32 %v740_v40, %v1180_v0  ;;  %764 = vst [vmem:[%s1243_s19 + $0x38] sm:$0xff] %v740_v40 }
 0x210   : > { %756 = vst [vmem:[%s1256_s26 + $0x38] sm:$0xff] %v748_v41 }
 0x211 PF: > { %s17_s23 = sadd.s32 1, %s1023_s23   ;;  %s1343_s21 = smov %s1019_s22 }
 0x212   : > { %p14_p5 = scmp.ge.s32.totalorder %s17_s23, 4   ;;  %s1344_s22 = smov %s1346_s24 }
 0x214   :  { %16 = sbr.rel (!%p14_p5) target bundleno = 2 (0x2), region = 82 }

</bundles_post_ra>
